<compile_context>
chip_gen: v5e
topology: v5e:2x2
jax: 0.10.0
libtpu: 0.0.40
codegen_flags: <defaults>
</compile_context>

<pallas_src>
import functools

import jax
import jax.numpy as jnp
from jax.experimental import pallas as pl
from jax.experimental.pallas import tpu as pltpu


# ---------------------------------------------------------------------------
# Tiling
# ---------------------------------------------------------------------------
def _round_up(x, m):
    return ((x + m - 1) // m) * m


_TM_MAX = 1024                            # max rows per block
_TK_MAX = 8192                            # max lane elements per block (>=16 KiB f32 row segments)
_FEAT_BLOCK_BUDGET = 24 * 1024 * 1024     # double-buffered feature block + per-row buffers
_VMEM_LIMIT_BYTES = 48 * 1024 * 1024      # < v7x 64 MiB physical; ample headroom on v5e/v6e


def _choose_tiles(M, K, itemsize, tile_m=None, tile_k=None):
    """Pick (tm, tk): rows x lane-elements per block.

    Prefers full-K contiguous row blocks, keeps the double-buffered feature tile plus
    the lane-padded per-row buffers within a VMEM budget that is safe on v5e/v6e
    (128 MiB) and v7x (64 MiB), and splits M into >=2 blocks when possible so both
    v7x TensorCores get work (neutral on v5e/v6e).
    """
    m8 = _round_up(max(M, 1), 8)
    kp0 = _round_up(max(K, 1), 128)

    # K tile: full K when it fits; otherwise a multiple of 128, ideally a divisor of
    # the 128-padded K so no extra padding (and no extra HBM copy) is needed.
    if tile_k is not None:
        tk = max(128, _round_up(tile_k, 128))
    elif kp0 <= _TK_MAX:
        tk = kp0
    else:
        tk = _TK_MAX
        for g in range(_TK_MAX // 128, 3, -1):          # tk in [512, 8192]
            if (kp0 // 128) % g == 0:
                tk = g * 128
                break

    # M tile: as many rows as the budget allows.  Each row carries the double-buffered
    # (tm, tk) feature slice plus ~4 KiB of lane-padded (tm,128)/(tm,1) buffers.
    if tile_m is not None:
        tm = max(8, _round_up(tile_m, 8))
    else:
        tm = min(m8, _TM_MAX)
        while tm > 8 and (2 * tm * tk * itemsize + tm * 4096) > _FEAT_BLOCK_BUDGET:
            tm = max(8, _round_up(tm // 2, 8))
        # Give v7x's second TensorCore something to do: >= 2 row blocks when M allows.
        if m8 >= 16 and _round_up(M, tm) // tm < 2:
            tm = max(8, _round_up((m8 + 1) // 2, 8))
    return tm, tk


# ---------------------------------------------------------------------------
# Kernels
# ---------------------------------------------------------------------------
def _accumulate_chunks(x_ref, acc_sum, acc_sq):
    """Lane-dense partial accumulation.

    Loads vreg-aligned 128-lane chunks of the (tm, tk) block and accumulates sum and
    sum-of-squares into (tm, 128) f32 accumulators with pure VPU adds (no per-step
    cross-lane reduce, no 1/128-utilized accumulator vregs).
    """
    tm, tk = x_ref.shape
    n_chunks = tk // 128
    c = x_ref[:, 0:128].astype(jnp.float32)
    ps = c
    pq = c * c
    for g in range(1, n_chunks):                         # static, vreg-aligned slices
        c = x_ref[:, g * 128:(g + 1) * 128].astype(jnp.float32)
        ps = ps + c
        pq = pq + c * c
    acc_sum[...] += ps
    acc_sq[...] += pq


def _finalize_stats(acc_sum, acc_sq, inv_n, inv_nm1):
    """Single cross-lane reduce (XLU) + mean / unbiased variance."""
    s = jnp.sum(acc_sum[...], axis=1, keepdims=True)     # (tm, 1)
    q = jnp.sum(acc_sq[...], axis=1, keepdims=True)      # (tm, 1)
    mean = s * inv_n
    var = (q - s * mean) * inv_nm1                        # unbiased (correction=1)
    return mean, var


def _mean_var_kernel(x_ref, mean_ref, var_ref, acc_sum, acc_sq, *, inv_n, inv_nm1):
    """Per-row mean and unbiased variance of a (Mp, Kp) matrix; grid = (row, K) blocks."""
    k = pl.program_id(1)

    @pl.when(k == 0)
    def _init():
        acc_sum[...] = jnp.zeros_like(acc_sum)
        acc_sq[...] = jnp.zeros_like(acc_sq)

    _accumulate_chunks(x_ref, acc_sum, acc_sq)

    @pl.when(k == pl.num_programs(1) - 1)
    def _finalize():
        mean, var = _finalize_stats(acc_sum, acc_sq, inv_n, inv_nm1)
        mean_ref[...] = mean
        var_ref[...] = var


def _mean_var_loss_kernel(x_ref, tmean_ref, tvar_ref, sqerr_ref, acc_sum, acc_sq,
                          *, inv_n, inv_nm1):
    """Fused: per-row mean/var of x, then per-row squared error vs target mean/var."""
    k = pl.program_id(1)

    @pl.when(k == 0)
    def _init():
        acc_sum[...] = jnp.zeros_like(acc_sum)
        acc_sq[...] = jnp.zeros_like(acc_sq)

    _accumulate_chunks(x_ref, acc_sum, acc_sq)

    @pl.when(k == pl.num_programs(1) - 1)
    def _finalize():
        mean, var = _finalize_stats(acc_sum, acc_sq, inv_n, inv_nm1)
        dm = mean - tmean_ref[...]
        dv = var - tvar_ref[...]
        sqerr_ref[...] = dm * dm + dv * dv


# ---------------------------------------------------------------------------
# pallas_call wrappers
# ---------------------------------------------------------------------------
def _compiler_params():
    return pltpu.CompilerParams(
        dimension_semantics=("parallel", "arbitrary"),
        vmem_limit_bytes=_VMEM_LIMIT_BYTES)


def channel_mean_var(x, tile_m=None, tile_k=None):
    """Per-(batch, channel) mean and unbiased variance over spatial dims (NCHW)."""
    a, b, c, d = x.shape
    M, K = a * b, c * d
    feats = x.reshape(M, K)                               # native dtype, no forced upcast
    tm, tk = _choose_tiles(M, K, feats.dtype.itemsize, tile_m, tile_k)
    Mp, Kp = _round_up(M, tm), _round_up(K, tk)
    if (Mp, Kp) != (M, K):
        # zeros perturb neither the sum nor the sum of squares; true K in denominators
        feats = jnp.pad(feats, ((0, Mp - M), (0, Kp - K)))
    n_m, n_k = Mp // tm, Kp // tk
    inv_n = 1.0 / K
    inv_nm1 = 1.0 / (K - 1) if K > 1 else float("nan")    # torch.var(unbiased) -> NaN at K==1

    mean, var = pl.pallas_call(
        functools.partial(_mean_var_kernel, inv_n=inv_n, inv_nm1=inv_nm1),
        out_shape=(jax.ShapeDtypeStruct((Mp, 1), jnp.float32),
                   jax.ShapeDtypeStruct((Mp, 1), jnp.float32)),
        grid=(n_m, n_k),
        in_specs=[pl.BlockSpec((tm, tk), lambda i, k: (i, k))],
        out_specs=(pl.BlockSpec((tm, 1), lambda i, k: (i, 0)),
                   pl.BlockSpec((tm, 1), lambda i, k: (i, 0))),
        scratch_shapes=[pltpu.VMEM((tm, 128), jnp.float32),
                        pltpu.VMEM((tm, 128), jnp.float32)],
        compiler_params=_compiler_params(),
        cost_estimate=pl.CostEstimate(
            flops=3 * Mp * Kp, transcendentals=0,
            bytes_accessed=Mp * Kp * feats.dtype.itemsize + 2 * Mp * 4),
    )(feats)
    return mean[:M].reshape(a, b, 1, 1), var[:M].reshape(a, b, 1, 1)


def mean_var_style_loss(x, target_mean, target_var, tile_m=None, tile_k=None):
    """mse(mean(x,(2,3)), target_mean) + mse(var(x,(2,3)), target_var), fused per row."""
    a, b, c, d = x.shape
    M, K = a * b, c * d
    feats = x.reshape(M, K)
    tmean = target_mean.reshape(M, 1).astype(jnp.float32)
    tvar = target_var.reshape(M, 1).astype(jnp.float32)
    tm, tk = _choose_tiles(M, K, feats.dtype.itemsize, tile_m, tile_k)
    Mp, Kp = _round_up(M, tm), _round_up(K, tk)
    if (Mp, Kp) != (M, K):
        feats = jnp.pad(feats, ((0, Mp - M), (0, Kp - K)))
    if Mp != M:
        tmean = jnp.pad(tmean, ((0, Mp - M), (0, 0)))
        tvar = jnp.pad(tvar, ((0, Mp - M), (0, 0)))
    n_m, n_k = Mp // tm, Kp // tk
    inv_n = 1.0 / K
    inv_nm1 = 1.0 / (K - 1) if K > 1 else float("nan")

    sqerr = pl.pallas_call(
        functools.partial(_mean_var_loss_kernel, inv_n=inv_n, inv_nm1=inv_nm1),
        out_shape=jax.ShapeDtypeStruct((Mp, 1), jnp.float32),
        grid=(n_m, n_k),
        in_specs=[pl.BlockSpec((tm, tk), lambda i, k: (i, k)),
                  pl.BlockSpec((tm, 1), lambda i, k: (i, 0)),
                  pl.BlockSpec((tm, 1), lambda i, k: (i, 0))],
        out_specs=pl.BlockSpec((tm, 1), lambda i, k: (i, 0)),
        scratch_shapes=[pltpu.VMEM((tm, 128), jnp.float32),
                        pltpu.VMEM((tm, 128), jnp.float32)],
        compiler_params=_compiler_params(),
        cost_estimate=pl.CostEstimate(
            flops=3 * Mp * Kp, transcendentals=0,
            bytes_accessed=Mp * Kp * feats.dtype.itemsize + 3 * Mp * 4),
    )(feats, tmean, tvar)
    # Final reduction over M per-row values (tiny) in plain JAX: a scalar accumulator
    # cannot be shared across the "parallel" row-block axis inside the kernel.
    return jnp.sum(sqerr[:M, 0]) / M


class MeanVarStyleLoss:
    """JAX/Pallas port of the PyTorch MeanVarStyleLoss module (transparent layer)."""

    def __init__(self, target_feature):
        tmean, tvar = channel_mean_var(target_feature)
        self.target_mean = jax.lax.stop_gradient(tmean)   # constants, like buffers
        self.target_var = jax.lax.stop_gradient(tvar)
        self.mean_var_loss = None

    def __call__(self, x):
        # Python-side loss state mirrors the PyTorch module; under jit/grad this
        # attribute holds a tracer — prefer the functional mean_var_style_loss().
        self.mean_var_loss = mean_var_style_loss(x, self.target_mean, self.target_var)
        return x  # transparent pass-through, exactly like the PyTorch module


# ---------------------------------------------------------------------------
# Main
# ---------------------------------------------------------------------------
if __name__ == "__main__":
    key = jax.random.PRNGKey(0)
    k_tgt, k_in, k_t2, k_i2, k_t3, k_i3 = jax.random.split(key, 6)

    def ref_stats(t):
        m = jnp.mean(t, axis=(2, 3), keepdims=True)
        v = jnp.var(t, axis=(2, 3), keepdims=True, ddof=1)
        return m, v

    def ref_loss(x, tmean, tvar):
        im, iv = ref_stats(x)
        return jnp.mean((im - tmean) ** 2) + jnp.mean((iv - tvar) ** 2)

    # primary small NCHW shapes: batch=2, channels=4, spatial 16x16
    target_feature = jax.random.normal(k_tgt, (2, 4, 16, 16), dtype=jnp.float32)
    x = jax.random.normal(k_in, (2, 4, 16, 16), dtype=jnp.float32)

    module = MeanVarStyleLoss(target_feature)
    out = jax.block_until_ready(module(x))
    loss = jax.block_until_ready(module.mean_var_loss)

    tm_ref, tv_ref = ref_stats(target_feature)
    loss_ref = ref_loss(x, tm_ref, tv_ref)

    assert out.shape == x.shape and bool(jnp.allclose(out, x))
    assert bool(jnp.allclose(module.target_mean, tm_ref, rtol=1e-4, atol=1e-5))
    assert bool(jnp.allclose(module.target_var, tv_ref, rtol=1e-4, atol=1e-5))
    assert bool(jnp.allclose(loss, loss_ref, rtol=1e-4, atol=1e-5))

    # multi-block grid path: 2 row blocks (parallel axis) x 2 K blocks (streaming accum)
    t2 = jax.random.normal(k_t2, (2, 8, 16, 16), dtype=jnp.float32)
    x2 = jax.random.normal(k_i2, (2, 8, 16, 16), dtype=jnp.float32)
    t2m, t2v = ref_stats(t2)
    loss2 = jax.block_until_ready(
        mean_var_style_loss(x2, t2m, t2v, tile_m=8, tile_k=128))
    assert bool(jnp.allclose(loss2, ref_loss(x2, t2m, t2v), rtol=1e-4, atol=1e-5))

    # non-128-aligned spatial size and non-8-aligned M: exercises the zero-padding path
    t3 = jax.random.normal(k_t3, (3, 3, 15, 15), dtype=jnp.float32)
    x3 = jax.random.normal(k_i3, (3, 3, 15, 15), dtype=jnp.float32)
    t3m, t3v = ref_stats(t3)
    m3, v3 = channel_mean_var(x3)
    i3m, i3v = ref_stats(x3)
    loss3 = jax.block_until_ready(mean_var_style_loss(x3, t3m, t3v))
    assert bool(jnp.allclose(m3, i3m, rtol=1e-4, atol=1e-5))
    assert bool(jnp.allclose(v3, i3v, rtol=1e-4, atol=1e-5))
    assert bool(jnp.allclose(loss3, ref_loss(x3, t3m, t3v), rtol=1e-4, atol=1e-5))

    print("KERNEL_OK")
</pallas_src>

<mosaic_0001>
module attributes {stable_mosaic.version = 11 : i64} {
  func.func @_mean_var_kernel(%arg0: i32, %arg1: i32, %arg2: memref<8x256xf32, #tpu.memory_space<vmem>>, %arg3: memref<8x1xf32, #tpu.memory_space<vmem>>, %arg4: memref<8x1xf32, #tpu.memory_space<vmem>>, %arg5: memref<8x128xf32, #tpu.memory_space<vmem>>, %arg6: memref<8x128xf32, #tpu.memory_space<vmem>>) attributes {dimension_semantics = [#tpu.dimension_semantics<parallel>, #tpu.dimension_semantics<arbitrary>], iteration_bounds = array<i64: 1, 1>, scalar_prefetch = 0 : i64, scratch_operands = 2 : i64, tpu.core_type = #tpu.core_type<tc>, window_params = [{transform_indices = @transform_0, window_bounds = array<i64: 8, 256>}, {transform_indices = @transform_1, window_bounds = array<i64: 8, 1>}, {transform_indices = @transform_2, window_bounds = array<i64: 8, 1>}]} {
    %c0_i32 = arith.constant 0 : i32
    %0 = arith.cmpi eq, %arg1, %c0_i32 : i32
    %1 = arith.extui %0 : i1 to i32
    %c0_i32_0 = arith.constant 0 : i32
    %2 = arith.cmpi ne, %1, %c0_i32_0 : i32
    scf.if %2 {
      %cst = arith.constant 0.000000e+00 : f32
      %18 = vector.broadcast %cst : f32 to vector<8x128xf32>
      %c0_13 = arith.constant 0 : index
      %c0_14 = arith.constant 0 : index
      %19 = vector.load %arg5[%c0_13, %c0_14] : memref<8x128xf32, #tpu.memory_space<vmem>>, vector<8x128xf32>
      tpu.vector_store %arg5[%c0_13, %c0_14], %18 {strides = array<i32>} : memref<8x128xf32, #tpu.memory_space<vmem>>, vector<8x128xf32>,
      %cst_15 = arith.constant 0.000000e+00 : f32
      %20 = vector.broadcast %cst_15 : f32 to vector<8x128xf32>
      %c0_16 = arith.constant 0 : index
      %c0_17 = arith.constant 0 : index
      %21 = vector.load %arg6[%c0_16, %c0_17] : memref<8x128xf32, #tpu.memory_space<vmem>>, vector<8x128xf32>
      tpu.vector_store %arg6[%c0_16, %c0_17], %20 {strides = array<i32>} : memref<8x128xf32, #tpu.memory_space<vmem>>, vector<8x128xf32>,
    } else {
    }
    %c0 = arith.constant 0 : index
    %c0_1 = arith.constant 0 : index
    %3 = vector.load %arg2[%c0, %c0_1] : memref<8x256xf32, #tpu.memory_space<vmem>>, vector<8x128xf32>
    %4 = arith.mulf %3, %3 : vector<8x128xf32>
    %c0_2 = arith.constant 0 : index
    %c128 = arith.constant 128 : index
    %5 = vector.load %arg2[%c0_2, %c128] : memref<8x256xf32, #tpu.memory_space<vmem>>, vector<8x128xf32>
    %6 = arith.addf %3, %5 : vector<8x128xf32>
    %7 = arith.mulf %5, %5 : vector<8x128xf32>
    %8 = arith.addf %4, %7 : vector<8x128xf32>
    %c0_3 = arith.constant 0 : index
    %c0_4 = arith.constant 0 : index
    %9 = vector.load %arg5[%c0_3, %c0_4] : memref<8x128xf32, #tpu.memory_space<vmem>>, vector<8x128xf32>
    %10 = arith.addf %9, %6 : vector<8x128xf32>
    %c0_5 = arith.constant 0 : index
    %c0_6 = arith.constant 0 : index
    %11 = vector.load %arg5[%c0_5, %c0_6] : memref<8x128xf32, #tpu.memory_space<vmem>>, vector<8x128xf32>
    tpu.vector_store %arg5[%c0_5, %c0_6], %10 {strides = array<i32>} : memref<8x128xf32, #tpu.memory_space<vmem>>, vector<8x128xf32>,
    %c0_7 = arith.constant 0 : index
    %c0_8 = arith.constant 0 : index
    %12 = vector.load %arg6[%c0_7, %c0_8] : memref<8x128xf32, #tpu.memory_space<vmem>>, vector<8x128xf32>
    %13 = arith.addf %12, %8 : vector<8x128xf32>
    %c0_9 = arith.constant 0 : index
    %c0_10 = arith.constant 0 : index
    %14 = vector.load %arg6[%c0_9, %c0_10] : memref<8x128xf32, #tpu.memory_space<vmem>>, vector<8x128xf32>
    tpu.vector_store %arg6[%c0_9, %c0_10], %13 {strides = array<i32>} : memref<8x128xf32, #tpu.memory_space<vmem>>, vector<8x128xf32>,
    %c0_i32_11 = arith.constant 0 : i32
    %15 = arith.cmpi eq, %arg1, %c0_i32_11 : i32
    %16 = arith.extui %15 : i1 to i32
    %c0_i32_12 = arith.constant 0 : i32
    %17 = arith.cmpi ne, %16, %c0_i32_12 : i32
    scf.if %17 {
      %c0_13 = arith.constant 0 : index
      %c0_14 = arith.constant 0 : index
      %18 = vector.load %arg5[%c0_13, %c0_14] : memref<8x128xf32, #tpu.memory_space<vmem>>, vector<8x128xf32>
      %cst = arith.constant dense<0.000000e+00> : vector<8xf32>
      %19 = vector.multi_reduction <add>, %18, %cst [1] : vector<8x128xf32> to vector<8xf32>
      %20 = vector.shape_cast %19 : vector<8xf32> to vector<8x1xf32>
      %c0_15 = arith.constant 0 : index
      %c0_16 = arith.constant 0 : index
      %21 = vector.load %arg6[%c0_15, %c0_16] : memref<8x128xf32, #tpu.memory_space<vmem>>, vector<8x128xf32>
      %cst_17 = arith.constant dense<0.000000e+00> : vector<8xf32>
      %22 = vector.multi_reduction <add>, %21, %cst_17 [1] : vector<8x128xf32> to vector<8xf32>
      %23 = vector.shape_cast %22 : vector<8xf32> to vector<8x1xf32>
      %cst_18 = arith.constant 3.906250e-03 : f32
      %24 = vector.broadcast %cst_18 : f32 to vector<8x1xf32>
      %25 = arith.mulf %20, %24 : vector<8x1xf32>
      %26 = arith.mulf %20, %25 : vector<8x1xf32>
      %27 = arith.subf %23, %26 : vector<8x1xf32>
      %cst_19 = arith.constant 0.00392156886 : f32
      %28 = vector.broadcast %cst_19 : f32 to vector<8x1xf32>
      %29 = arith.mulf %27, %28 : vector<8x1xf32>
      %c0_20 = arith.constant 0 : index
      %c0_21 = arith.constant 0 : index
      %30 = vector.load %arg3[%c0_20, %c0_21] : memref<8x1xf32, #tpu.memory_space<vmem>>, vector<8x1xf32>
      tpu.vector_store %arg3[%c0_20, %c0_21], %25 {strides = array<i32>} : memref<8x1xf32, #tpu.memory_space<vmem>>, vector<8x1xf32>,
      %c0_22 = arith.constant 0 : index
      %c0_23 = arith.constant 0 : index
      %31 = vector.load %arg4[%c0_22, %c0_23] : memref<8x1xf32, #tpu.memory_space<vmem>>, vector<8x1xf32>
      tpu.vector_store %arg4[%c0_22, %c0_23], %29 {strides = array<i32>} : memref<8x1xf32, #tpu.memory_space<vmem>>, vector<8x1xf32>,
    } else {
    }
    return
  }
  func.func @transform_0(%arg0: i32, %arg1: i32) -> (i32, i32) {
    %c0_i32 = arith.constant 0 : i32
    return %arg0, %arg1 : i32, i32
  }
  func.func @transform_1(%arg0: i32, %arg1: i32) -> (i32, i32) {
    %c0_i32 = arith.constant 0 : i32
    %c0_i32_0 = arith.constant 0 : i32
    return %arg0, %c0_i32 : i32, i32
  }
  func.func @transform_2(%arg0: i32, %arg1: i32) -> (i32, i32) {
    %c0_i32 = arith.constant 0 : i32
    %c0_i32_0 = arith.constant 0 : i32
    return %arg0, %c0_i32 : i32, i32
  }
}

</mosaic_0001>

<bundles_post_ra>
// kernel: tpu_custom_call.1
= control target key start
LH: loop header
LB: loop body
LE: loop exit
PB: predicated region body
PF: predicated region fallthrough
CT: control target
= control target key end

     0   :  { %8 = vsyncpa [#allocation5], 0  ;;  %s94_s12 = smov [#allocation4]   ;;  %s119_s0 = inlined_call_operand.hbm [shape: f32[8,256], index: 0, kind: input, shape index: {}]   ;;  %s120_s1 = inlined_call_operand.vmem [shape: f32[8,1], index: 1, kind: output, shape index: {0}]   ;;  %s121_s2 = inlined_call_operand.vmem [shape: f32[8,1], index: 2, kind: output, shape index: {1}]  }
   0x1   :  { %s14_s11 = sshll.u32 %s119_s0, 4  ;;  %s16_s13 = sshll.u32 %s94_s12, 4  ;;  %s15_s11 = int_to_ptr.hbm [resolvable:$true] %s14_s11  ;;  %s17_s13 = int_to_ptr.vmem [resolvable:$true] %s16_s13 }
   0x2   :  { %19 = dma.hbm_to_vmem [thread:$0]  %s15_s11, 256, %s17_s13, [#allocation5]  }
   0x3   :  { %92 = dma.done.wait [#allocation5], 256  }
   0x4   :  { %93 = vsyncadd [#allocation5], 4294967040  ;;  %v30_v0 = vld [vmem:[#allocation4] sm:$0xff]  ;;  %v32_v1 = vld [vmem:[#allocation4 + $0x8] sm:$0xff]  ;;  %vm55_vm0 = vcmask 7168  }
   0x5   :  { %v33_v2 = vadd.f32 %v32_v1, %v30_v0  ;;  %v34_v3 = vmul.f32 %v32_v1, %v32_v1  ;;  %v31_v4 = vmul.f32 %v30_v0, %v30_v0 }
   0x7   :  { %46 = vadd.xlane.f32.xlu0 %v33_v2  ;;  %v35_v5 = vadd.f32 %v34_v3, %v31_v4 }
   0xf   :  { %49 = vadd.xlane.f32.xlu0 %v35_v5 }
  0x7a   :  { %v47_v6 = vpop.xlane.xlu0 %46 }
  0x7b   :  { %v51_v7 = vmul.f32 0.00390625, %v47_v6 }
  0x7d   :  { %56 = vst.msk [vmem:[%s120_s1] sm:$0xff] %vm55_vm0, %v51_v7  ;;  %v52_v8 = vmul.f32 %v51_v7, %v47_v6 }
  0x82   :  { %v50_v9 = vpop.xlane.xlu0 %49 }
  0x83   :  { %v53_v10 = vsub.f32 %v50_v9, %v52_v8 }
  0x85   :  { %v54_v11 = vmul.f32 0.003921569, %v53_v10 }
  0x87   :  { %57 = vst.msk [vmem:[%s121_s2] sm:$0xff] %vm55_vm0, %v54_v11 }
  0x88   :  { %66 = vsyncpa [#allocation5], 1 }

</bundles_post_ra>
